<compile_context>
chip_gen: v7x
topology: tpu7x:2x2x1
jax: 0.10.0
libtpu: 0.0.40
codegen_flags: <defaults>
</compile_context>

<pallas_src>
import functools

import jax
import jax.numpy as jnp
from jax import lax
from jax.experimental import pallas as pl
from jax.experimental.pallas import tpu as pltpu

_LANES = 128


def _cdiv(a, b):
    return -(-a // b)


def _round_up(a, b):
    return _cdiv(a, b) * b


@functools.partial(jax.jit, static_argnames=("block_cols",))
def loss_mse(pred, gt, *, block_cols=131072):
    """JAX/Pallas equivalent of Loss_MSE.forward(pred, gt). Returns an f32 scalar."""
    assert pred.shape[:-1] == gt.shape[:-1]
    assert pred.shape[-1] == 7
    assert gt.shape[-1] >= 8

    lead = pred.shape[:-1]
    n = 1
    for d in lead:
        n *= d
    c = gt.shape[-1]

    # Keep only the channels the loss uses (7 targets + mask channel) so the
    # kernel never DMAs unused gt channels, then go channel-first so the large
    # N axis maps onto the 128-lane dimension (lane-dense tiles).
    gt8 = gt if c == 8 else jnp.concatenate([gt[..., :7], gt[..., -1:]], axis=-1)
    pred_t = pred.reshape(n, 7).T      # (7, N)
    gt8_t = gt8.reshape(n, 8).T        # (8, N): rows 0..6 = targets, row 7 = mask

    # Column tile: large (amortizes per-step overhead), multiple of 128 lanes.
    tn = _round_up(min(block_cols, n), _LANES)
    num_col_blocks = _cdiv(n, tn)
    n_par = 2 if num_col_blocks >= 2 else 1     # v7x: 2 TCs; no-op elsewhere
    k_inner = _cdiv(num_col_blocks, n_par)

    # Is any column-masking needed at all?  (tail columns or padded duplicate
    # blocks from the parallel split).  Static at trace time -> compiled out.
    needs_mask = (n % tn != 0) or (n_par * k_inner != num_col_blocks)

    def _col_block(p, k):
        # Padding blocks of the parallel split re-read the last valid block;
        # the in-kernel column mask zeroes their contribution.
        return jnp.minimum(p * k_inner + k, num_col_blocks - 1)

    def _kernel(pred_ref, gt_ref, out_ref, acc_ref):
        p = pl.program_id(0)
        k = pl.program_id(1)

        @pl.when(k == 0)
        def _():
            acc_ref[...] = jnp.zeros_like(acc_ref)

        g = gt_ref[...].astype(jnp.float32)        # (8, tn)
        q = pred_ref[...].astype(jnp.float32)      # (7, tn)

        diff = (g[0:7, :] - q) * g[7:8, :]         # mask broadcast over sublanes
        sq = diff * diff
        if needs_mask:
            col_start = (p * k_inner + k) * tn
            col_ids = col_start + lax.broadcasted_iota(jnp.int32, (1, tn), 1)
            # where() also discards NaN/Inf garbage from out-of-bounds columns.
            sq = jnp.where(col_ids < n, sq, 0.0)
        acc_ref[...] += sq

        @pl.when(k == pl.num_programs(1) - 1)
        def _():
            out_ref[...] = jnp.sum(acc_ref[...]).reshape(1, 1, 1)

    # VMEM budget: double-buffered inputs (2*(7+8)*tn*4) + accumulator (7*tn*4).
    vmem_bytes = 37 * tn * 4 + (2 << 20)
    vmem_limit = int(min(64 << 20, max(32 << 20, vmem_bytes)))

    partials = pl.pallas_call(
        _kernel,
        out_shape=jax.ShapeDtypeStruct((n_par, 1, 1), jnp.float32),
        grid_spec=pltpu.PrefetchScalarGridSpec(
            num_scalar_prefetch=0,
            grid=(n_par, k_inner),
            in_specs=[
                pl.BlockSpec((7, tn), lambda p, k: (0, _col_block(p, k))),
                pl.BlockSpec((8, tn), lambda p, k: (0, _col_block(p, k))),
            ],
            out_specs=pl.BlockSpec((1, 1, 1), lambda p, k: (p, 0, 0)),
            scratch_shapes=[pltpu.VMEM((7, tn), jnp.float32)],
        ),
        compiler_params=pltpu.CompilerParams(
            dimension_semantics=("parallel", "arbitrary"),
            vmem_limit_bytes=vmem_limit,
        ),
    )(pred_t, gt8_t)

    # mean over the full (B, D1, D2, D3, 7) masked-diff tensor (mask==0 rows
    # intentionally included in the denominator, matching torch.mean).
    denom = jnp.float32(n * 7)
    return (jnp.sum(partials) / denom).astype(jnp.float32)


def _reference(pred, gt):
    mask = gt[..., -1]
    loss = (gt[..., :7] - pred) * mask[..., None]
    return jnp.mean(jnp.square(loss))


if __name__ == "__main__":
    key = jax.random.PRNGKey(0)

    # Case 1: canonical shape, gt channels = 7 targets + 1 mask, single tile
    # (mask-free fast path: N not a multiple of 128 -> still needs tail mask?
    #  here N = 2*4*4*4 = 128, exact multiple, so the where() is compiled out).
    k1, k2, k3 = jax.random.split(key, 3)
    B, D1, D2, D3 = 2, 4, 4, 4
    gt = jax.random.normal(k1, (B, D1, D2, D3, 8), dtype=jnp.float32)
    mask = (jax.random.uniform(k2, (B, D1, D2, D3)) > 0.5).astype(jnp.float32)
    gt = gt.at[..., -1].set(mask)
    pred = jax.random.normal(k3, (B, D1, D2, D3, 7), dtype=jnp.float32)

    out = jax.block_until_ready(loss_mse(pred, gt))
    ref = _reference(pred, gt)
    assert jnp.allclose(out, ref, rtol=1e-5, atol=1e-6), (out, ref)

    # Case 2: C > 8 (channel trimming), row count not a multiple of 128 (tail
    # masking), small block_cols (multi-block grid + 2-way parallel split).
    k4, k5, k6 = jax.random.split(jax.random.PRNGKey(1), 3)
    B2, E1, E2, E3, C = 2, 4, 6, 7, 9
    gt2 = jax.random.normal(k4, (B2, E1, E2, E3, C), dtype=jnp.float32)
    mask2 = (jax.random.uniform(k5, (B2, E1, E2, E3)) > 0.5).astype(jnp.float32)
    gt2 = gt2.at[..., -1].set(mask2)
    pred2 = jax.random.normal(k6, (B2, E1, E2, E3, 7), dtype=jnp.float32)

    out2 = jax.block_until_ready(loss_mse(pred2, gt2, block_cols=128))
    ref2 = _reference(pred2, gt2)
    assert jnp.allclose(out2, ref2, rtol=1e-5, atol=1e-6), (out2, ref2)

    print("KERNEL_OK")
</pallas_src>

<mosaic_0001>
module attributes {stable_mosaic.version = 11 : i64} {
  func.func @_kernel(%arg0: i32, %arg1: i32, %arg2: memref<7x128xf32, #tpu.memory_space<vmem>>, %arg3: memref<8x128xf32, #tpu.memory_space<vmem>>, %arg4: memref<1x1x1xf32, #tpu.memory_space<vmem>>, %arg5: memref<7x128xf32, #tpu.memory_space<vmem>>) attributes {dimension_semantics = [#tpu.dimension_semantics<parallel>, #tpu.dimension_semantics<arbitrary>], iteration_bounds = array<i64: 1, 1>, scalar_prefetch = 0 : i64, scratch_operands = 1 : i64, tpu.core_type = #tpu.core_type<tc>, window_params = [{transform_indices = @transform_0, window_bounds = array<i64: 7, 128>}, {transform_indices = @transform_1, window_bounds = array<i64: 8, 128>}, {transform_indices = @transform_2, window_bounds = array<i64: 1, 1, 1>}]} {
    %c0_i32 = arith.constant 0 : i32
    %0 = arith.cmpi eq, %arg1, %c0_i32 : i32
    %1 = arith.extui %0 : i1 to i32
    %c0_i32_0 = arith.constant 0 : i32
    %2 = arith.cmpi ne, %1, %c0_i32_0 : i32
    scf.if %2 {
      %cst = arith.constant 0.000000e+00 : f32
      %17 = vector.broadcast %cst : f32 to vector<7x128xf32>
      %c0_10 = arith.constant 0 : index
      %c0_11 = arith.constant 0 : index
      %18 = vector.load %arg5[%c0_10, %c0_11] : memref<7x128xf32, #tpu.memory_space<vmem>>, vector<7x128xf32>
      tpu.vector_store %arg5[%c0_10, %c0_11], %17 {strides = array<i32>} : memref<7x128xf32, #tpu.memory_space<vmem>>, vector<7x128xf32>,
    } else {
    }
    %c0 = arith.constant 0 : index
    %c0_1 = arith.constant 0 : index
    %3 = vector.load %arg3[%c0, %c0_1] : memref<8x128xf32, #tpu.memory_space<vmem>>, vector<8x128xf32>
    %c0_2 = arith.constant 0 : index
    %c0_3 = arith.constant 0 : index
    %4 = vector.load %arg2[%c0_2, %c0_3] : memref<7x128xf32, #tpu.memory_space<vmem>>, vector<7x128xf32>
    %5 = vector.extract_strided_slice %3 {offsets = [0, 0], sizes = [7, 128], strides = [1, 1]} : vector<8x128xf32> to vector<7x128xf32>
    %6 = arith.subf %5, %4 : vector<7x128xf32>
    %7 = vector.extract_strided_slice %3 {offsets = [7, 0], sizes = [1, 128], strides = [1, 1]} : vector<8x128xf32> to vector<1x128xf32>
    %8 = vector.broadcast %7 : vector<1x128xf32> to vector<7x128xf32>
    %9 = arith.mulf %6, %8 : vector<7x128xf32>
    %10 = arith.mulf %9, %9 : vector<7x128xf32>
    %c0_4 = arith.constant 0 : index
    %c0_5 = arith.constant 0 : index
    %11 = vector.load %arg5[%c0_4, %c0_5] : memref<7x128xf32, #tpu.memory_space<vmem>>, vector<7x128xf32>
    %12 = arith.addf %11, %10 : vector<7x128xf32>
    %c0_6 = arith.constant 0 : index
    %c0_7 = arith.constant 0 : index
    %13 = vector.load %arg5[%c0_6, %c0_7] : memref<7x128xf32, #tpu.memory_space<vmem>>, vector<7x128xf32>
    tpu.vector_store %arg5[%c0_6, %c0_7], %12 {strides = array<i32>} : memref<7x128xf32, #tpu.memory_space<vmem>>, vector<7x128xf32>,
    %c0_i32_8 = arith.constant 0 : i32
    %14 = arith.cmpi eq, %arg1, %c0_i32_8 : i32
    %15 = arith.extui %14 : i1 to i32
    %c0_i32_9 = arith.constant 0 : i32
    %16 = arith.cmpi ne, %15, %c0_i32_9 : i32
    scf.if %16 {
      %c0_10 = arith.constant 0 : index
      %c0_11 = arith.constant 0 : index
      %17 = vector.load %arg5[%c0_10, %c0_11] : memref<7x128xf32, #tpu.memory_space<vmem>>, vector<7x128xf32>
      %18 = vector.shape_cast %17 : vector<7x128xf32> to vector<1x7x128xf32>
      %cst = arith.constant dense<0.000000e+00> : vector<1xf32>
      %19 = vector.multi_reduction <add>, %18, %cst [1, 2] : vector<1x7x128xf32> to vector<1xf32>
      %20 = vector.shape_cast %19 : vector<1xf32> to vector<1x1x1xf32>
      %21 = vector.extract %20[0, 0, 0] : f32 from vector<1x1x1xf32>
      %22 = vector.broadcast %21 : f32 to vector<1x1x1xf32>
      %c0_12 = arith.constant 0 : index
      %c0_13 = arith.constant 0 : index
      %c0_14 = arith.constant 0 : index
      %23 = vector.load %arg4[%c0_12, %c0_13, %c0_14] : memref<1x1x1xf32, #tpu.memory_space<vmem>>, vector<1x1x1xf32>
      tpu.vector_store %arg4[%c0_12, %c0_13, %c0_14], %22 {strides = array<i32>} : memref<1x1x1xf32, #tpu.memory_space<vmem>>, vector<1x1x1xf32>,
    } else {
    }
    return
  }
  func.func @transform_0(%arg0: i32, %arg1: i32) -> (i32, i32) {
    %c1_i32 = arith.constant 1 : i32
    %0 = arith.muli %arg0, %c1_i32 : i32
    %1 = arith.addi %0, %arg1 : i32
    %c0_i32 = arith.constant 0 : i32
    %2 = arith.minsi %1, %c0_i32 : i32
    %c0_i32_0 = arith.constant 0 : i32
    %c0_i32_1 = arith.constant 0 : i32
    return %c0_i32_0, %2 : i32, i32
  }
  func.func @transform_1(%arg0: i32, %arg1: i32) -> (i32, i32) {
    %c1_i32 = arith.constant 1 : i32
    %0 = arith.muli %arg0, %c1_i32 : i32
    %1 = arith.addi %0, %arg1 : i32
    %c0_i32 = arith.constant 0 : i32
    %2 = arith.minsi %1, %c0_i32 : i32
    %c0_i32_0 = arith.constant 0 : i32
    %c0_i32_1 = arith.constant 0 : i32
    return %c0_i32_0, %2 : i32, i32
  }
  func.func @transform_2(%arg0: i32, %arg1: i32) -> (i32, i32, i32) {
    %c0_i32 = arith.constant 0 : i32
    %c0_i32_0 = arith.constant 0 : i32
    %c0_i32_1 = arith.constant 0 : i32
    return %arg0, %c0_i32, %c0_i32_0 : i32, i32, i32
  }
}

</mosaic_0001>

<bundles_post_ra>
// kernel: loss_mse.1
= control target key start
LH: loop header
LB: loop body
LE: loop exit
PB: predicated region body
PF: predicated region fallthrough
CT: control target
= control target key end

     0   :  { %v74_v0 = vlaneseq  ;;  %v155_v1 = vmov 0.0   ;;  %s190_s0 = inlined_call_operand.vmem [shape: f32[7,128], index: 0, kind: input, shape index: {}]   ;;  %s191_s1 = inlined_call_operand.vmem [shape: f32[8,128], index: 1, kind: input, shape index: {}]   ;;  %s192_s2 = inlined_call_operand.hbm [shape: f32[1,1,1], index: 2, kind: output, shape index: {}]  }
   0x1   :  { %70 = vst [vmem:[#allocation2] sm:$0x7f] %v155_v1  ;;  %v71_v2 = vld [vmem:[%s191_s1] sm:$0xff] }
   0x2   :  { %v72_v3 = vld [vmem:[%s190_s0] sm:$0x7f] }
   0x3   :  { %7 = vsyncpa [#allocation4], 0  ;;  %v75_v4 = vshrl.u32 %v74_v0, 7  ;;  %v73_v5 = vsub.f32 %v71_v2, %v72_v3  ;;  %vm87_vm0 = vcmask 1046528   ;;  %s156_s0 = smov [#allocation3]   ;;  %vm99_vm1 = vcmask 0  }
   0x4   :  { %s107_s1 = sshll.u32 %s156_s0, 4  ;;  %s108_s1 = int_to_ptr.vmem [resolvable:$true] %s107_s1 }
   0x5   :  { %v76_v6 = vsub.s32 7, %v75_v4  ;;  %s131_s14 = scalar_lea.vmem %s108_s1, 16  ;;  %s135_s15 = scalar_lea.vmem %s108_s1, 32 }
   0x6   :  { %p132_p0 = scmp.ne.s32.totalorder %s108_s1, %s131_s14  ;;  %p136_p1 = scmp.lt.s32.totalorder %s108_s1, %s108_s1 }
   0x7   :  { %v77_v7 = vrot.slane %v71_v2, %v76_v6  ;;  %p137_p2 = scmp.lt.s32.totalorder %s135_s15, %s131_s14 }
   0x8   :  { %v80_v9 = vld [vmem:[#allocation2] sm:$0x7f] }
   0x9   :  { %v78_v8 = vmul.f32 %v77_v7, %v73_v5  ;;  %p138_p3 = por %p137_p2, %p136_p1 }
   0xb   :  { %v79_v10 = vmul.f32 %v78_v8, %v78_v8  ;;  %p139_p4 = pnand %p138_p3, %p132_p0 }
   0xd   :  { %v81_v11 = vadd.f32 %v80_v9, %v79_v10 }
   0xf   :  { %82 = vst [vmem:[#allocation2] sm:$0x7f] %v81_v11 }
  0x16   :  { %v86_v12 = vld [vmem:[#allocation2] sm:$0x7f] }
  0x17   :  { %v88_v13 = vsel %vm87_vm0, %v86_v12, 0.0 }
  0x18   :  { %89 = vadd.xlane.f32.xlu0 %v88_v13 }
  0xa5   :  { %v90_v14 = vpop.xlane.xlu0 %89 }
  0xa6   :  { %v91_v15 = vrot.slane %v90_v14, 4 }
  0xa8   :  { %v92_v16 = vadd.f32 %v91_v15, %v90_v14 }
  0xaa   :  { %v93_v17 = vrot.slane %v92_v16, 2 }
  0xac   :  { %v94_v18 = vadd.f32 %v93_v17, %v92_v16 }
  0xae   :  { %v95_v19 = vrot.slane %v94_v18, 1 }
  0xb0   :  { %v96_v20 = vadd.f32 %v95_v19, %v94_v18 }
  0xb2   :  { %127 = vpush %v96_v20 }
  0xe3   :  { %s128_s13 = spop %127 }
  0xe4   :  { %v98_v21 = vstv %s128_s13 }
  0xe5   :  { %100 = vst.msk [vmem:[#allocation3] sm:$0x1] %vm99_vm1, %v98_v21 }
  0xe6   :  { %142 = shalt.err (!%p139_p4)
}
  0xe7   :  { %s143_s18 = scalar_lea.hbm %s192_s2, 16 }
  0xe8   :  { %p144_p5 = scmp.ne.s32.totalorder %s192_s2, %s143_s18  ;;  %p147_p6 = scmp.lt.u32.totalorder %s143_s18, %s192_s2 }
  0xea   :  { %p149_p7 = pnand %p147_p6, %p144_p5 }
  0xec   :  { %152 = shalt.err (!%p149_p7)
}
  0xed   :  { %110 = dma.vmem_to_hbm [thread:$0]  %s108_s1, 16, %s192_s2, [#allocation4]  }
  0xee   :  { %153 = dma.done.wait [#allocation4], 16  }
  0xef   :  { %154 = vsyncadd [#allocation4], 4294967280 }
  0xf0   :  { %114 = vsyncpa [#allocation4], 1 }

</bundles_post_ra>
